<compile_context>
chip_gen: v6e
topology: v6e:2x2x1
jax: 0.10.0
libtpu: 0.0.40
codegen_flags: <defaults>
</compile_context>

<pallas_src>
import jax
import jax.numpy as jnp
from jax.experimental import pallas as pl
from jax.experimental.pallas import tpu as pltpu

_LANES = 128
_SUBLANES = 8
_TARGET_BLOCK_BYTES = 2 * 1024 * 1024  # per-operand block size target


def _normalize_kernel(scale_ref, bias_ref, x_ref, o_ref):
    # scale_ref / bias_ref: full (C,) f32 vectors in SMEM (scalar reads).
    # x_ref / o_ref: (N, 1, TR, 128) lane-dense VMEM tiles for channel c.
    c = pl.program_id(0)
    scale = scale_ref[c]
    bias = bias_ref[c]
    # Single FMA per element; keeps the kernel purely HBM-streaming bound.
    o_ref[...] = (x_ref[...] * scale + bias).astype(o_ref.dtype)


def normalization_forward(x, mean, std):
    """(x - mean[:, None, None]) / std[:, None, None] for NCHW input x."""
    N, C, H, W = x.shape
    assert mean.shape == (C,) and std.shape == (C,)

    # Precompute per-channel scale/bias in the wrapper (negligible cost),
    # turning the per-element divide into a multiply-add in the kernel.
    inv_std = (1.0 / std).astype(jnp.float32)
    bias = (-mean.astype(jnp.float32)) * inv_std

    # ---- lane-dense layout: flatten H*W and view as (rows, 128) ----
    L = H * W
    R = (L + _LANES - 1) // _LANES                      # rows of 128 lanes
    R8 = ((R + _SUBLANES - 1) // _SUBLANES) * _SUBLANES  # sublane-aligned rows

    # Row tile: multiple of 8, sized so one block (N, 1, TR, 128) is ~2 MiB.
    bytes_per_row = N * _LANES * x.dtype.itemsize
    tr_cap = max(_SUBLANES, (_TARGET_BLOCK_BYTES // bytes_per_row)
                 // _SUBLANES * _SUBLANES)
    TR = min(tr_cap, R8)
    R_pad = ((R + TR - 1) // TR) * TR                   # multiple of TR (and 8)
    L_pad = R_pad * _LANES

    x2 = x.reshape(N, C, L)
    if L_pad != L:
        # Zero padding; padded elements produce finite garbage (mul+add, no
        # divide) and are sliced off below.
        x2 = jnp.pad(x2, ((0, 0), (0, 0), (0, L_pad - L)))
    x3 = x2.reshape(N, C, R_pad, _LANES)

    grid = (C, R_pad // TR)

    out3 = pl.pallas_call(
        _normalize_kernel,
        out_shape=jax.ShapeDtypeStruct((N, C, R_pad, _LANES), x.dtype),
        grid=grid,
        in_specs=[
            pl.BlockSpec(memory_space=pltpu.MemorySpace.SMEM),  # scale (C,)
            pl.BlockSpec(memory_space=pltpu.MemorySpace.SMEM),  # bias  (C,)
            pl.BlockSpec((N, 1, TR, _LANES), lambda c, r: (0, c, r, 0)),
        ],
        out_specs=pl.BlockSpec((N, 1, TR, _LANES), lambda c, r: (0, c, r, 0)),
        compiler_params=pltpu.CompilerParams(
            dimension_semantics=("parallel", "parallel")
        ),
    )(inv_std, bias, x3)

    out = out3.reshape(N, C, L_pad)
    if L_pad != L:
        out = out[:, :, :L]
    return out.reshape(N, C, H, W)


if __name__ == "__main__":
    # Deterministic parameters from the module's __init__ defaults.
    mean = jnp.array([0.485, 0.456, 0.406], dtype=jnp.float32)
    std = jnp.array([0.229, 0.224, 0.225], dtype=jnp.float32)

    # Small NCHW input consistent with a 3-channel image normalization.
    key = jax.random.PRNGKey(0)
    x = jax.random.uniform(key, (2, 3, 16, 16), dtype=jnp.float32)

    out = normalization_forward(x, mean, std)
    out = jax.block_until_ready(out)

    # Reference check in plain JAX (same semantics as the PyTorch forward).
    ref = (x - mean[None, :, None, None]) / std[None, :, None, None]
    assert jnp.allclose(out, ref, atol=1e-5, rtol=1e-5), "mismatch vs reference"

    # TODO(synk): `recover` (x * std + mean, clamped to [0,1]) not implemented;
    # only the forward pass was requested.
    print("KERNEL_OK")
</pallas_src>

<mosaic_0001>
module attributes {stable_mosaic.version = 11 : i64} {
  func.func @_normalize_kernel(%arg0: i32, %arg1: i32, %arg2: memref<3xf32, #tpu.memory_space<smem>>, %arg3: memref<3xf32, #tpu.memory_space<smem>>, %arg4: memref<2x1x8x128xf32, #tpu.memory_space<vmem>>, %arg5: memref<2x1x8x128xf32, #tpu.memory_space<vmem>>) attributes {dimension_semantics = [#tpu.dimension_semantics<parallel>, #tpu.dimension_semantics<parallel>], iteration_bounds = array<i64: 3, 1>, scalar_prefetch = 0 : i64, scratch_operands = 0 : i64, tpu.core_type = #tpu.core_type<tc>, window_params = [{transform_indices = @transform_0, window_bounds = array<i64: 3>}, {transform_indices = @transform_1, window_bounds = array<i64: 3>}, {transform_indices = @transform_2, window_bounds = array<i64: 2, 1, 8, 128>}, {transform_indices = @transform_3, window_bounds = array<i64: 2, 1, 8, 128>}]} {
    %0 = arith.index_cast %arg0 : i32 to index
    %1 = memref.load %arg2[%0] : memref<3xf32, #tpu.memory_space<smem>>
    %2 = arith.index_cast %arg0 : i32 to index
    %3 = memref.load %arg3[%2] : memref<3xf32, #tpu.memory_space<smem>>
    %c0 = arith.constant 0 : index
    %c0_0 = arith.constant 0 : index
    %c0_1 = arith.constant 0 : index
    %c0_2 = arith.constant 0 : index
    %4 = vector.load %arg4[%c0, %c0_0, %c0_1, %c0_2] : memref<2x1x8x128xf32, #tpu.memory_space<vmem>>, vector<2x1x8x128xf32>
    %5 = vector.broadcast %1 : f32 to vector<2x1x8x128xf32>
    %6 = arith.mulf %4, %5 : vector<2x1x8x128xf32>
    %7 = vector.broadcast %3 : f32 to vector<2x1x8x128xf32>
    %8 = arith.addf %6, %7 : vector<2x1x8x128xf32>
    %c0_3 = arith.constant 0 : index
    %c0_4 = arith.constant 0 : index
    %c0_5 = arith.constant 0 : index
    %c0_6 = arith.constant 0 : index
    %9 = vector.load %arg5[%c0_3, %c0_4, %c0_5, %c0_6] : memref<2x1x8x128xf32, #tpu.memory_space<vmem>>, vector<2x1x8x128xf32>
    tpu.vector_store %arg5[%c0_3, %c0_4, %c0_5, %c0_6], %8 {strides = array<i32>} : memref<2x1x8x128xf32, #tpu.memory_space<vmem>>, vector<2x1x8x128xf32>,
    return
  }
  func.func @transform_0(%arg0: i32, %arg1: i32) -> i32 {
    %c0_i32 = arith.constant 0 : i32
    %c0_i32_0 = arith.constant 0 : i32
    return %c0_i32 : i32
  }
  func.func @transform_1(%arg0: i32, %arg1: i32) -> i32 {
    %c0_i32 = arith.constant 0 : i32
    %c0_i32_0 = arith.constant 0 : i32
    return %c0_i32 : i32
  }
  func.func @transform_2(%arg0: i32, %arg1: i32) -> (i32, i32, i32, i32) {
    %c0_i32 = arith.constant 0 : i32
    %c0_i32_0 = arith.constant 0 : i32
    %c0_i32_1 = arith.constant 0 : i32
    return %c0_i32, %arg0, %arg1, %c0_i32_0 : i32, i32, i32, i32
  }
  func.func @transform_3(%arg0: i32, %arg1: i32) -> (i32, i32, i32, i32) {
    %c0_i32 = arith.constant 0 : i32
    %c0_i32_0 = arith.constant 0 : i32
    %c0_i32_1 = arith.constant 0 : i32
    return %c0_i32, %arg0, %arg1, %c0_i32_0 : i32, i32, i32, i32
  }
}

</mosaic_0001>

<bundles_post_ra>
// kernel: tpu_custom_call.1
= control target key start
LH: loop header
LB: loop body
LE: loop exit
PB: predicated region body
PF: predicated region fallthrough
CT: control target
= control target key end

     0   :  { %8 = vsyncpa [#allocation5], 0  ;;  %s826_s0 = inlined_call_operand.hbm [shape: f32[3], index: 0, kind: input, shape index: {}]   ;;  %s827_s1 = inlined_call_operand.vmem [shape: f32[3], index: 1, kind: input, shape index: {}]   ;;  %s828_s2 = inlined_call_operand.hbm [shape: f32[2,3,8,128], index: 2, kind: input, shape index: {}]   ;;  %s829_s3 = inlined_call_operand.hbm [shape: f32[2,3,8,128], index: 3, kind: output, shape index: {}]  }
   0x1   :  { %9 = vsyncpa [#allocation6], 0 }
   0x2   :  { %10 = vsyncpa [#allocation3], 0 }
   0x3   :  { %12 = vsyncpa [#allocation3 + $0x1], 0 }
   0x4   :  { %13 = vsyncpa [#allocation4], 0 }
   0x5   :  { %15 = vsyncpa [#allocation4 + $0x1], 0  ;;  %s643_s12 = smov 0   ;;  %s645_s13 = smov 0  }
   0x6   :  { %s647_s14 = smov 0   ;;  %s649_s15 = smov 0  }
   0x7   :  { %s651_s16 = smov 0   ;;  %s653_s17 = smov 0  }
   0x8 LB: > { %s363_s18 = sadd.s32 4294967295, %s611_s17   ;;  %s364_s19 = sadd.s32 4294967294, %s611_s17   ;;  %s611_s17 = sphi %s653_s17, %s21_s17   ;;  %s607_s16 = sphi %s651_s16, %s844_s16   ;;  %s603_s15 = sphi %s649_s15, %s843_s15   ;;  %s599_s14 = sphi %s647_s14, %s842_s14   ;;  %s595_s13 = sphi %s645_s13, %s841_s13   ;;  %s591_s12 = sphi %s643_s12, %s840_s12  }
   0x9   : > { %s84_s20 = sadd.s32 1, %s599_s14  ;;  %p91_p0 = scmp.ne.s32.totalorder %s599_s14, %s595_s13 }
   0xa   : > { %p92_p1 = scmp.eq.s32.totalorder %s611_s17, 0  ;;  %p97_p2 = scmp.ne.s32.totalorder %s595_s13, %s591_s12 }
   0xb   : > { %p681_p3 = scmp.eq.s32.totalorder %s363_s18, 0  ;;  %p123_p4 = scmp.eq.s32.totalorder %s363_s18, 2 }
   0xc   : > { %p93_p5 = por %p92_p1, %p91_p0  ;;  %p129_p6 = scmp.eq.s32.totalorder %s364_s19, 2 }
   0xd   : > { %p687_p7 = por %p681_p3, %p97_p2  ;;  %p691_p8 = por %p123_p4, %p91_p0 }
   0xe   : > { %p695_p9 = por %p129_p6, %p97_p2  ;;  %p365_p10 = scmp.ge.s32.totalorder %s611_s17, 1 }
   0xf   : > { %s833_s23 = scalar_select %p691_p8, 1, 0 }
  0x10   : > { %s834_s24 = scalar_select %p695_p9, 1, 0 }
  0x11   : > { %p136_p11 = scmp.lt.s32.totalorder %s611_s17, 4  ;;  %p409_p13 = scmp.lt.s32.totalorder %s611_s17, 3 }
  0x12   : > { %s158_s28 = sshll.u32 %s827_s1, 4  ;;  %s169_s4 = sand.u32 1, %s599_s14   ;;  %s159_s28 = int_to_ptr.vmem [resolvable:$true] %s158_s28 }
  0x13   : > { %p701_p12 = pnand %p365_p10, %p136_p11  ;;  %p711_p1 = pnand %p409_p13, %p93_p5 }
  0x14   : > { %s33_s5 = sadd.s32 1, %s607_s16  ;;  %s613_s6 = smov [#allocation2]  }
  0x15   : > { %p392_p0 = pneg %p701_p12  ;;  %s480_s9 = scalar_lea.vmem %s159_s28, 16 }
  0x16   : > { %p481_p4 = scmp.ne.s32.totalorder %s159_s28, %s480_s9  ;;  %p488_p11 = scmp.lt.s32.totalorder %s159_s28, %s159_s28 }
  0x17   : > { %p717_p2 = pnand %p392_p0, %p681_p3  ;;  %p489_p13 = scmp.lt.s32.totalorder %s480_s9, %s480_s9 }
  0x19   : > { %395 = dma.hbm_to_smem (!%p717_p2), %s826_s0, 16, %s613_s6, [#allocation5]  }
  0x1a   : > { %p482_p5 = pneg %p717_p2  ;;  %p490_p0 = por %p489_p13, %p488_p11 }
  0x1c   : > { %p483_p6 = pnand %p482_p5, %p481_p4 }
  0x1e   : > { %p484_p10 = pneg %p483_p6 }
  0x20   : > { %p491_p9 = pnand %p490_p0, %p484_p10 }
  0x22   : > { %494 = shalt.err (!%p491_p9)
}
  0x23   : > { %s614_s10 = smov [#allocation7]   ;;  %p35_p8 = scmp.ge.s32.totalorder %s33_s5, 3 }
  0x24   : > { %398 = dma.vmem_to_smem (!%p717_p2), %s159_s28, 16, %s614_s10, [#allocation6]  }
  0x25   : > { %s369_s11 = sshll.u32 %s169_s4, 4  ;;  %s370_s18 = sshll.u32 %s607_s16, 7 }
  0x26   : > { %s846_s5 = smov (%p35_p8, %s33_s5), 0  ;;  %s738_s27 = scalar_lea.hbm %s828_s2, %s370_s18 }
  0x27   : > { %s79_s6 = ssub.s32 %s607_s16, %s846_s5  ;;  %s173_s7 = scalar_lea.vmem [#allocation8], %s369_s11 }
  0x28   : > { %s180_s30 = sshll.u32 %s173_s7, 4  ;;  %p82_p9 = scmp.eq.s32.totalorder %s79_s6, 0  ;;  %s181_s30 = int_to_ptr.vmem [resolvable:$true] %s180_s30 }
  0x29   : > { %s170_s28 = scalar_lea.sflag [#allocation3], %s169_s4  ;;  %p497_p2 = pneg %p711_p1 }
  0x2a   : > { %s745_s8 = scalar_select %p82_p9, %s599_s14, %s84_s20  }
  0x2b   : > { %s508_s9 = scalar_lea.vmem %s181_s30, 256  ;;  %s615_s10 = smov [#allocation8]  }
  0x2c   : > { %p509_p8 = scmp.ne.s32.totalorder %s181_s30, %s508_s9  ;;  %s513_s19 = sshll.u32 %s615_s10, 4  ;;  %s514_s19 = int_to_ptr.vmem [resolvable:$false] %s513_s19 }
  0x2d   : > { %s515_s18 = scalar_lea.vmem %s514_s19, 512  ;;  %p516_p6 = scmp.lt.s32.totalorder %s181_s30, %s514_s19 }
  0x2e   : > { %p511_p4 = pnand %p509_p8, %p497_p2  ;;  %p517_p10 = scmp.lt.s32.totalorder %s515_s18, %s508_s9 }
  0x30   : > { %p512_p5 = pneg %p511_p4  ;;  %p518_p11 = por %p517_p10, %p516_p6 }
  0x32   : > { %p519_p13 = pnand %p518_p11, %p512_p5 }
  0x34   : > { %522 = shalt.err (!%p519_p13)
}
  0x35   : > { %s616_s11 = smov 384   ;;  %s617_s20 = smov 128  }
  0x36   : > { %s618_s4 = smov 8   ;;  %192 = sbr.rel (%p701_p12) target bundleno = 96 (0x60), region = 32 }
  0x37   : > { %402 = dma.hbm_to_vmem [thread:$0]  (!%p711_p1), %s738_s27, 256, %s181_s30, %s170_s28, %s616_s11, %s617_s20, %s618_s4  }
  0x3b   : > { %574 = dma.done.wait (%p681_p3), [#allocation5], 16  }
  0x3c   : > { %576 = vsyncadd (%p681_p3), [#allocation5], 4294967280 }
  0x3d   : > { %578 = dma.done.wait (%p681_p3), [#allocation6], 16  }
  0x3e   : > { %580 = vsyncadd (%p681_p3), [#allocation6], 4294967280  ;;  %s763_s26 = sand.u32 1, %s595_s13  }
  0x3f   : > { %s374_s25 = sshll.u32 %s763_s26, 4  ;;  %s203_s29 = scalar_lea.sflag [#allocation3], %s763_s26 }
  0x40   : > { %s206_s27 = scalar_lea.vmem [#allocation8], %s374_s25 }
  0x41   : > { %582 = dma.done.wait (%p687_p7), %s203_s29, 256  }
  0x42   : > { %584 = vsyncadd (%p687_p7), %s203_s29, 4294967040 }
  0x43   : > { %211 = sfence }
  0x44   : > { %s230_s21 = sld [smem:[#allocation2 + %s603_s15]]  ;;  %v232_v0 = vld [vmem:[%s206_s27] sm:$0xff]  ;;  %s229_s7 = scalar_lea.vmem [#allocation9], %s374_s25  ;;  %v233_v1 = vld [vmem:[%s206_s27 + $0x8] sm:$0xff] }
  0x45   : > { %s231_s6 = sld [smem:[#allocation7 + %s603_s15]]  ;;  %s256_s30 = sshll.u32 %s229_s7, 4  ;;  %s774_s30 = int_to_ptr.vmem [resolvable:$true] %s256_s30 }
  0x46   : > { %s377_s28 = sshll.u32 %s603_s15, 7  ;;  %s243_s19 = scalar_lea.sflag [#allocation4], %s763_s26 }
  0x47   : > { %s779_s10 = scalar_lea.hbm %s829_s3, %s377_s28  ;;  %s523_s15 = scalar_lea.vmem %s774_s30, 256 }
  0x48   : > { %p524_p3 = scmp.ne.s32.totalorder %s774_s30, %s523_s15  ;;  %p838_p7 = scmp.ne.s32.totalorder %s833_s23, 0 }
  0x49   : > { %s619_s18 = smov [#allocation9]  }
  0x4a   : > { %v234_v2 = vstv %s230_s21  ;;  %p525_p12 = pnand %p524_p3, %p838_p7  ;;  %s527_s11 = sshll.u32 %s619_s18, 4  ;;  %s528_s11 = int_to_ptr.vmem [resolvable:$false] %s527_s11 }
  0x4b   : > { %v235_v3 = vmul.f32 %v234_v2, %v232_v0  ;;  %v237_v4 = vstv %s231_s6  ;;  %v236_v5 = vmul.f32 %v234_v2, %v233_v1  ;;  %s529_s20 = scalar_lea.vmem %s528_s11, 512  ;;  %p530_p0 = scmp.lt.s32.totalorder %s774_s30, %s528_s11 }
  0x4c   : > { %p526_p1 = pneg %p525_p12  ;;  %p531_p9 = scmp.lt.s32.totalorder %s529_s20, %s523_s15 }
  0x4d   : > { %v238_v6 = vadd.f32 %v237_v4, %v235_v3  ;;  %v239_v7 = vadd.f32 %v237_v4, %v236_v5 }
  0x4e   : > { %p532_p2 = por %p531_p9, %p530_p0 }
  0x4f   : > { %240 = vst [vmem:[%s229_s7] sm:$0xff] %v238_v6  ;;  %241 = vst [vmem:[%s229_s7 + $0x8] sm:$0xff] %v239_v7 }
  0x50   : > { %p533_p8 = pnand %p532_p2, %p526_p1 }
  0x52   : > { %536 = shalt.err (!%p533_p8)
}
  0x53   : > { %s537_s4 = scalar_lea.hbm %s779_s10, 256  ;;  %s541_s27 = scalar_lea.hbm %s829_s3, 768 }
  0x54   : > { %p538_p4 = scmp.ne.s32.totalorder %s779_s10, %s537_s4  ;;  %p542_p10 = scmp.lt.s32.totalorder %s779_s10, %s829_s3 }
  0x55   : > { %p543_p11 = scmp.lt.s32.totalorder %s541_s27, %s537_s4 }
  0x56   : > { %p539_p5 = pnand %p538_p4, %p838_p7 }
  0x57   : > { %p544_p13 = por %p543_p11, %p542_p10 }
  0x58   : > { %p540_p6 = pneg %p539_p5 }
  0x5a   : > { %p545_p3 = pnand %p544_p13, %p540_p6 }
  0x5c   : > { %548 = shalt.err (!%p545_p3)
}
  0x5d   : > { %s620_s7 = smov 128   ;;  %s621_s28 = smov 384  }
  0x5e   : > { %s622_s22 = smov 8  }
  0x5f   : > { %390 = dma.vmem_to_hbm [thread:$0]  (%p838_p7), %s774_s30, 256, %s779_s10, %s243_s19, %s620_s7, %s621_s28, %s622_s22  }
  0x60 PF: > { %p412_p12 = scmp.ge.s32.totalorder %s611_s17, 2  ;;  %s271_s9 = sand.u32 1, %s591_s12  }
  0x61   : > { %p839_p1 = scmp.ne.s32.totalorder %s834_s24, 0  ;;  %s272_s15 = scalar_lea.sflag [#allocation4], %s271_s9 }
  0x63   : > { %p404_p0 = pnand %p412_p12, %p839_p1 }
  0x65   : > { %p405_p9 = pneg %p404_p0 }
  0x67   : > { %586 = dma.done.wait (%p405_p9), %s272_s15, 256  }
  0x68   : > { %588 = vsyncadd (%p405_p9), %s272_s15, 4294967040  ;;  %s21_s17 = sadd.s32 1, %s611_s17   ;;  %s840_s12 = smov %s595_s13 }
  0x69   : > { %p18_p2 = scmp.ge.s32.totalorder %s21_s17, 5   ;;  %s841_s13 = smov %s599_s14 }
  0x6a   : > { %s842_s14 = smov %s745_s8  ;;  %s843_s15 = smov %s607_s16 }
  0x6b   : > { %s844_s16 = smov %s846_s5  ;;  %20 = sbr.rel (!%p18_p2) target bundleno = 8 (0x8), region = 87 }
  0x70   :  { %277 = vsyncpa [#allocation3], 1 }
  0x71   :  { %279 = vsyncpa [#allocation3 + $0x1], 1 }
  0x72   :  { %280 = vsyncpa [#allocation4], 1 }
  0x73   :  { %282 = vsyncpa [#allocation4 + $0x1], 1 }
  0x74   :  { %283 = vsyncpa [#allocation5], 1 }
  0x75   :  { %285 = vsyncpa [#allocation5 + $0x1], 1 }
  0x76   :  { %286 = vsyncpa [#allocation6], 1 }
  0x77   :  { %288 = vsyncpa [#allocation6 + $0x1], 1 }

</bundles_post_ra>
